<compile_context>
chip_gen: v7x
topology: tpu7x:2x2x1
jax: 0.10.0
libtpu: 0.0.40
codegen_flags: <defaults>
</compile_context>

<pallas_src>
import jax
import jax.numpy as jnp
from jax.experimental import pallas as pl
from jax.experimental.pallas import tpu as pltpu

HIDDEN = [128, 128, 64, 64, 32]
NUM_CLASSES = 10
LANE = 128  # TPU lane width; all feature dims are padded to a multiple of this.


def _round_up(n, m):
    return ((n + m - 1) // m) * m


def dnn_kernel(x_ref, w1_ref, wrest_ref, b_ref, o_ref):
    """Fused 6-layer MLP on one [tile_m, F_pad] activation tile.

    x_ref:     [tile_m, F_pad]  bf16  activation tile
    w1_ref:    [F_pad, 128]     bf16  layer-1 weight (zero-padded rows)
    wrest_ref: [5, 128, 128]    bf16  layers 2..6, each zero-padded to 128x128
    b_ref:     [8, 128]         f32   rows 0..5 = biases of layers 1..6 (zero-padded lanes)
    o_ref:     [tile_m, 128]    f32   only lanes [0:NUM_CLASSES] are real classes
    """
    compute_dtype = w1_ref.dtype

    # Layer 1: Linear + ReLU (Dropout(0.25) is identity at inference).
    h = jnp.dot(x_ref[...], w1_ref[...], preferred_element_type=jnp.float32)
    h = jnp.maximum(h + b_ref[0:1, :], 0.0)

    # Hidden layers 2..5: Linear + ReLU.
    for layer in range(4):
        h = jnp.dot(h.astype(compute_dtype), wrest_ref[layer],
                    preferred_element_type=jnp.float32)
        h = jnp.maximum(h + b_ref[layer + 1:layer + 2, :], 0.0)

    # Output layer (no activation). Padded lanes 10..127 come out exactly zero.
    out = jnp.dot(h.astype(compute_dtype), wrest_ref[4],
                  preferred_element_type=jnp.float32) + b_ref[5:6, :]
    o_ref[...] = out.astype(o_ref.dtype)


def pack_params(params, num_features, compute_dtype=jnp.bfloat16):
    """Zero-pad every layer dim to a multiple of 128 and pack into 3 arrays.

    Returns (w1[F_pad,128] bf16, w_rest[5,128,128] bf16, b_all[8,128] f32, F_pad).
    Zero padding is mathematically exact (zeros stay zero through bias+ReLU).
    """
    dims = [num_features] + HIDDEN + [NUM_CLASSES]
    dims_pad = [_round_up(d, LANE) for d in dims]

    padded_w = []
    b_all = jnp.zeros((8, LANE), jnp.float32)
    for li, (w, b) in enumerate(params):
        fin, fout = dims[li], dims[li + 1]
        fin_p, fout_p = dims_pad[li], dims_pad[li + 1]
        wp = jnp.zeros((fin_p, fout_p), jnp.float32).at[:fin, :fout].set(w)
        padded_w.append(wp.astype(compute_dtype))
        b_all = b_all.at[li, :fout].set(b.reshape(-1))

    w1 = padded_w[0]                      # [F_pad, 128]
    w_rest = jnp.stack(padded_w[1:], 0)   # [5, 128, 128]
    return w1, w_rest, b_all, dims_pad[0]


def dnn_forward(x, packed, *, tile_m=256):
    """x: [B, num_features] float32. packed: output of pack_params."""
    w1, w_rest, b_all, f_pad = packed
    B, F = x.shape

    # Largest tile that divides the batch (whole batch for the B=64 demo -> grid=(1,)).
    tile = min(tile_m, B)
    assert B % tile == 0, "batch must be divisible by the chosen tile_m"
    grid = (B // tile,)

    x_pad = x
    if f_pad != F:
        x_pad = jnp.zeros((B, f_pad), x.dtype).at[:, :F].set(x)
    x_pad = x_pad.astype(w1.dtype)

    out_padded = pl.pallas_call(
        dnn_kernel,
        out_shape=jax.ShapeDtypeStruct((B, LANE), jnp.float32),
        grid_spec=pltpu.PrefetchScalarGridSpec(
            num_scalar_prefetch=0,
            grid=grid,
            in_specs=[
                pl.BlockSpec((tile, f_pad), lambda i: (i, 0)),       # activation tile
                pl.BlockSpec((f_pad, LANE), lambda i: (0, 0)),       # W1, resident
                pl.BlockSpec((5, LANE, LANE), lambda i: (0, 0, 0)),  # W2..W6, resident
                pl.BlockSpec((8, LANE), lambda i: (0, 0)),           # all biases, resident
            ],
            out_specs=pl.BlockSpec((tile, LANE), lambda i: (i, 0)),  # lane-dense output
        ),
        compiler_params=pltpu.CompilerParams(
            dimension_semantics=("parallel",),  # megacore-shard batch tiles (v7x)
        ),
    )(x_pad, w1, w_rest, b_all)

    return out_padded[:, :NUM_CLASSES]


def init_params(key, num_features):
    """PyTorch-default init; weights stored transposed as [in, out], biases 1-D [out]."""
    dims = [num_features] + HIDDEN + [NUM_CLASSES]
    params = []
    for fin, fout in zip(dims[:-1], dims[1:]):
        kw, kb, key = jax.random.split(key, 3)
        bound = 1.0 / jnp.sqrt(jnp.float32(fin))
        w = jax.random.uniform(kw, (fin, fout), jnp.float32, -bound, bound)
        b = jax.random.uniform(kb, (fout,), jnp.float32, -bound, bound)
        params.append((w, b))
    return params


def reference_forward_matched(x, params, compute_dtype=jnp.bfloat16):
    """Pure-JAX reference using the same bf16-operand / f32-accumulate recipe as the kernel."""
    h = x.astype(compute_dtype)
    for li, (w, b) in enumerate(params):
        h = jnp.dot(h, w.astype(compute_dtype), preferred_element_type=jnp.float32) + b
        if li < len(params) - 1:
            h = jnp.maximum(h, 0.0).astype(compute_dtype)
    return h


def reference_forward_f32(x, params):
    """Full-f32 reference (PyTorch-equivalent math); differs slightly due to bf16 operands."""
    h = x
    for (w, b) in params[:-1]:
        h = jnp.maximum(h @ w + b, 0.0)
    w, b = params[-1]
    return h @ w + b


if __name__ == "__main__":
    key = jax.random.PRNGKey(0)
    kx, kp = jax.random.split(key)

    batch = 64
    num_features = 256  # small synthetic feature count (already a multiple of 128)
    x = jax.random.normal(kx, (batch, num_features), jnp.float32)
    params = init_params(kp, num_features)

    packed = pack_params(params, num_features, compute_dtype=jnp.bfloat16)
    out = dnn_forward(x, packed)
    out = jax.block_until_ready(out)

    ref = reference_forward_matched(x, params, compute_dtype=jnp.bfloat16)
    assert out.shape == (batch, NUM_CLASSES)
    max_diff = float(jnp.max(jnp.abs(out - ref)))
    assert jnp.allclose(out, ref, atol=2e-2, rtol=2e-2), (
        f"mismatch vs bf16-matched reference: max abs diff {max_diff}")

    # TODO(synk): Dropout(p=0.25) in training mode would need pltpu.prng_random_bits masking;
    # forward/eval semantics make it an identity, so it is intentionally omitted.
    print("KERNEL_OK")
</pallas_src>

<mosaic_0001>
module attributes {stable_mosaic.version = 11 : i64} {
  func.func @dnn_kernel(%arg0: i32, %arg1: memref<64x256xbf16, #tpu.memory_space<vmem>>, %arg2: memref<256x128xbf16, #tpu.memory_space<vmem>>, %arg3: memref<5x128x128xbf16, #tpu.memory_space<vmem>>, %arg4: memref<8x128xf32, #tpu.memory_space<vmem>>, %arg5: memref<64x128xf32, #tpu.memory_space<vmem>>) attributes {dimension_semantics = [#tpu.dimension_semantics<parallel>], iteration_bounds = array<i64: 1>, scalar_prefetch = 0 : i64, scratch_operands = 0 : i64, tpu.core_type = #tpu.core_type<tc>, window_params = [{transform_indices = @transform_0, window_bounds = array<i64: 64, 256>}, {pipeline_mode = #tpu.pipeline_mode<synchronous>, transform_indices = @transform_1, window_bounds = array<i64: 256, 128>}, {pipeline_mode = #tpu.pipeline_mode<synchronous>, transform_indices = @transform_2, window_bounds = array<i64: 5, 128, 128>}, {pipeline_mode = #tpu.pipeline_mode<synchronous>, transform_indices = @transform_3, window_bounds = array<i64: 8, 128>}, {transform_indices = @transform_4, window_bounds = array<i64: 64, 128>}]} {
    %c0 = arith.constant 0 : index
    %c0_0 = arith.constant 0 : index
    %0 = vector.load %arg1[%c0, %c0_0] : memref<64x256xbf16, #tpu.memory_space<vmem>>, vector<64x256xbf16>
    %c0_1 = arith.constant 0 : index
    %c0_2 = arith.constant 0 : index
    %1 = vector.load %arg2[%c0_1, %c0_2] : memref<256x128xbf16, #tpu.memory_space<vmem>>, vector<256x128xbf16>
    %cst = arith.constant dense<0.000000e+00> : vector<64x128xf32>
    %2 = tpu.matmul %0, %1, %cst {dimension_numbers = #tpu.dot_dimension_numbers<[1], [0], [0], [1], [0, 0, 1, 1], [], []>} : vector<64x256xbf16>, vector<256x128xbf16>, vector<64x128xf32> -> vector<64x128xf32>
    %c0_3 = arith.constant 0 : index
    %c0_4 = arith.constant 0 : index
    %3 = vector.load %arg4[%c0_3, %c0_4] : memref<8x128xf32, #tpu.memory_space<vmem>>, vector<1x128xf32>
    %4 = vector.broadcast %3 : vector<1x128xf32> to vector<64x128xf32>
    %5 = arith.addf %2, %4 : vector<64x128xf32>
    %cst_5 = arith.constant 0.000000e+00 : f32
    %6 = vector.broadcast %cst_5 : f32 to vector<64x128xf32>
    %7 = arith.maximumf %5, %6 : vector<64x128xf32>
    %8 = arith.truncf %7 : vector<64x128xf32> to vector<64x128xbf16>
    %c0_6 = arith.constant 0 : index
    %c0_7 = arith.constant 0 : index
    %c0_8 = arith.constant 0 : index
    %9 = vector.load %arg3[%c0_6, %c0_7, %c0_8] : memref<5x128x128xbf16, #tpu.memory_space<vmem>>, vector<1x128x128xbf16>
    %10 = vector.shape_cast %9 : vector<1x128x128xbf16> to vector<128x128xbf16>
    %cst_9 = arith.constant dense<0.000000e+00> : vector<64x128xf32>
    %11 = tpu.matmul %8, %10, %cst_9 {dimension_numbers = #tpu.dot_dimension_numbers<[1], [0], [0], [1], [0, 0, 1, 1], [], []>} : vector<64x128xbf16>, vector<128x128xbf16>, vector<64x128xf32> -> vector<64x128xf32>
    %c1 = arith.constant 1 : index
    %c0_10 = arith.constant 0 : index
    %12 = vector.load %arg4[%c1, %c0_10] : memref<8x128xf32, #tpu.memory_space<vmem>>, vector<1x128xf32>
    %13 = vector.broadcast %12 : vector<1x128xf32> to vector<64x128xf32>
    %14 = arith.addf %11, %13 : vector<64x128xf32>
    %cst_11 = arith.constant 0.000000e+00 : f32
    %15 = vector.broadcast %cst_11 : f32 to vector<64x128xf32>
    %16 = arith.maximumf %14, %15 : vector<64x128xf32>
    %17 = arith.truncf %16 : vector<64x128xf32> to vector<64x128xbf16>
    %c1_12 = arith.constant 1 : index
    %c0_13 = arith.constant 0 : index
    %c0_14 = arith.constant 0 : index
    %18 = vector.load %arg3[%c1_12, %c0_13, %c0_14] : memref<5x128x128xbf16, #tpu.memory_space<vmem>>, vector<1x128x128xbf16>
    %19 = vector.shape_cast %18 : vector<1x128x128xbf16> to vector<128x128xbf16>
    %cst_15 = arith.constant dense<0.000000e+00> : vector<64x128xf32>
    %20 = tpu.matmul %17, %19, %cst_15 {dimension_numbers = #tpu.dot_dimension_numbers<[1], [0], [0], [1], [0, 0, 1, 1], [], []>} : vector<64x128xbf16>, vector<128x128xbf16>, vector<64x128xf32> -> vector<64x128xf32>
    %c2 = arith.constant 2 : index
    %c0_16 = arith.constant 0 : index
    %21 = vector.load %arg4[%c2, %c0_16] : memref<8x128xf32, #tpu.memory_space<vmem>>, vector<1x128xf32>
    %22 = vector.broadcast %21 : vector<1x128xf32> to vector<64x128xf32>
    %23 = arith.addf %20, %22 : vector<64x128xf32>
    %cst_17 = arith.constant 0.000000e+00 : f32
    %24 = vector.broadcast %cst_17 : f32 to vector<64x128xf32>
    %25 = arith.maximumf %23, %24 : vector<64x128xf32>
    %26 = arith.truncf %25 : vector<64x128xf32> to vector<64x128xbf16>
    %c2_18 = arith.constant 2 : index
    %c0_19 = arith.constant 0 : index
    %c0_20 = arith.constant 0 : index
    %27 = vector.load %arg3[%c2_18, %c0_19, %c0_20] : memref<5x128x128xbf16, #tpu.memory_space<vmem>>, vector<1x128x128xbf16>
    %28 = vector.shape_cast %27 : vector<1x128x128xbf16> to vector<128x128xbf16>
    %cst_21 = arith.constant dense<0.000000e+00> : vector<64x128xf32>
    %29 = tpu.matmul %26, %28, %cst_21 {dimension_numbers = #tpu.dot_dimension_numbers<[1], [0], [0], [1], [0, 0, 1, 1], [], []>} : vector<64x128xbf16>, vector<128x128xbf16>, vector<64x128xf32> -> vector<64x128xf32>
    %c3 = arith.constant 3 : index
    %c0_22 = arith.constant 0 : index
    %30 = vector.load %arg4[%c3, %c0_22] : memref<8x128xf32, #tpu.memory_space<vmem>>, vector<1x128xf32>
    %31 = vector.broadcast %30 : vector<1x128xf32> to vector<64x128xf32>
    %32 = arith.addf %29, %31 : vector<64x128xf32>
    %cst_23 = arith.constant 0.000000e+00 : f32
    %33 = vector.broadcast %cst_23 : f32 to vector<64x128xf32>
    %34 = arith.maximumf %32, %33 : vector<64x128xf32>
    %35 = arith.truncf %34 : vector<64x128xf32> to vector<64x128xbf16>
    %c3_24 = arith.constant 3 : index
    %c0_25 = arith.constant 0 : index
    %c0_26 = arith.constant 0 : index
    %36 = vector.load %arg3[%c3_24, %c0_25, %c0_26] : memref<5x128x128xbf16, #tpu.memory_space<vmem>>, vector<1x128x128xbf16>
    %37 = vector.shape_cast %36 : vector<1x128x128xbf16> to vector<128x128xbf16>
    %cst_27 = arith.constant dense<0.000000e+00> : vector<64x128xf32>
    %38 = tpu.matmul %35, %37, %cst_27 {dimension_numbers = #tpu.dot_dimension_numbers<[1], [0], [0], [1], [0, 0, 1, 1], [], []>} : vector<64x128xbf16>, vector<128x128xbf16>, vector<64x128xf32> -> vector<64x128xf32>
    %c4 = arith.constant 4 : index
    %c0_28 = arith.constant 0 : index
    %39 = vector.load %arg4[%c4, %c0_28] : memref<8x128xf32, #tpu.memory_space<vmem>>, vector<1x128xf32>
    %40 = vector.broadcast %39 : vector<1x128xf32> to vector<64x128xf32>
    %41 = arith.addf %38, %40 : vector<64x128xf32>
    %cst_29 = arith.constant 0.000000e+00 : f32
    %42 = vector.broadcast %cst_29 : f32 to vector<64x128xf32>
    %43 = arith.maximumf %41, %42 : vector<64x128xf32>
    %44 = arith.truncf %43 : vector<64x128xf32> to vector<64x128xbf16>
    %c4_30 = arith.constant 4 : index
    %c0_31 = arith.constant 0 : index
    %c0_32 = arith.constant 0 : index
    %45 = vector.load %arg3[%c4_30, %c0_31, %c0_32] : memref<5x128x128xbf16, #tpu.memory_space<vmem>>, vector<1x128x128xbf16>
    %46 = vector.shape_cast %45 : vector<1x128x128xbf16> to vector<128x128xbf16>
    %cst_33 = arith.constant dense<0.000000e+00> : vector<64x128xf32>
    %47 = tpu.matmul %44, %46, %cst_33 {dimension_numbers = #tpu.dot_dimension_numbers<[1], [0], [0], [1], [0, 0, 1, 1], [], []>} : vector<64x128xbf16>, vector<128x128xbf16>, vector<64x128xf32> -> vector<64x128xf32>
    %c5 = arith.constant 5 : index
    %c0_34 = arith.constant 0 : index
    %48 = vector.load %arg4[%c5, %c0_34] : memref<8x128xf32, #tpu.memory_space<vmem>>, vector<1x128xf32>
    %49 = vector.broadcast %48 : vector<1x128xf32> to vector<64x128xf32>
    %50 = arith.addf %47, %49 : vector<64x128xf32>
    %c0_35 = arith.constant 0 : index
    %c0_36 = arith.constant 0 : index
    %51 = vector.load %arg5[%c0_35, %c0_36] : memref<64x128xf32, #tpu.memory_space<vmem>>, vector<64x128xf32>
    tpu.vector_store %arg5[%c0_35, %c0_36], %50 {strides = array<i32>} : memref<64x128xf32, #tpu.memory_space<vmem>>, vector<64x128xf32>,
    return
  }
  func.func @transform_0(%arg0: i32) -> (i32, i32) {
    %c0_i32 = arith.constant 0 : i32
    %c0_i32_0 = arith.constant 0 : i32
    return %arg0, %c0_i32 : i32, i32
  }
  func.func @transform_1(%arg0: i32) -> (i32, i32) {
    %c0_i32 = arith.constant 0 : i32
    %c0_i32_0 = arith.constant 0 : i32
    %c0_i32_1 = arith.constant 0 : i32
    return %c0_i32, %c0_i32_0 : i32, i32
  }
  func.func @transform_2(%arg0: i32) -> (i32, i32, i32) {
    %c0_i32 = arith.constant 0 : i32
    %c0_i32_0 = arith.constant 0 : i32
    %c0_i32_1 = arith.constant 0 : i32
    %c0_i32_2 = arith.constant 0 : i32
    return %c0_i32, %c0_i32_0, %c0_i32_1 : i32, i32, i32
  }
  func.func @transform_3(%arg0: i32) -> (i32, i32) {
    %c0_i32 = arith.constant 0 : i32
    %c0_i32_0 = arith.constant 0 : i32
    %c0_i32_1 = arith.constant 0 : i32
    return %c0_i32, %c0_i32_0 : i32, i32
  }
  func.func @transform_4(%arg0: i32) -> (i32, i32) {
    %c0_i32 = arith.constant 0 : i32
    %c0_i32_0 = arith.constant 0 : i32
    return %arg0, %c0_i32 : i32, i32
  }
}

</mosaic_0001>

<bundles_post_ra>
// kernel: tpu_custom_call.1
= control target key start
LH: loop header
LB: loop body
LE: loop exit
PB: predicated region body
PF: predicated region fallthrough
CT: control target
= control target key end

     0   :  { %9 = vsyncpa [#allocation3], 0  ;;  %s1637_s0 = inlined_call_operand.hbm [shape: bf16[64,256], index: 0, kind: input, shape index: {}]   ;;  %s1638_s1 = inlined_call_operand.hbm [shape: bf16[256,128], index: 1, kind: input, shape index: {}]   ;;  %s1639_s2 = inlined_call_operand.hbm [shape: bf16[5,128,128], index: 2, kind: input, shape index: {}]   ;;  %s1640_s3 = inlined_call_operand.vmem [shape: f32[8,128], index: 3, kind: input, shape index: {}]   ;;  %s1641_s4 = inlined_call_operand.hbm [shape: f32[64,128], index: 4, kind: output, shape index: {}]  }
   0x1   :  { %10 = vsyncpa [#allocation6], 0 }
   0x2   :  { %11 = vsyncpa [#allocation4], 0  ;;  %s1526_s15 = smov [#allocation5]   ;;  %s1432_s19 = scalar_lea.hbm %s1638_s1, 2048 }
   0x3   :  { %s29_s16 = sshll.u32 %s1526_s15, 4  ;;  %p1433_p0 = scmp.ne.s32.totalorder %s1638_s1, %s1432_s19  ;;  %s30_s16 = int_to_ptr.vmem [resolvable:$true] %s29_s16 }
   0x4   :  { %p1436_p1 = scmp.lt.u32.totalorder %s1432_s19, %s1638_s1 }
   0x6   :  { %p1438_p2 = pnand %p1436_p1, %p1433_p0 }
   0x8   :  { %1441 = shalt.err (!%p1438_p2)
}
   0x9   :  { %s1442_s24 = scalar_lea.vmem %s30_s16, 2048  ;;  %p1447_p4 = scmp.lt.s32.totalorder %s30_s16, %s30_s16 }
   0xa   :  { %p1443_p3 = scmp.ne.s32.totalorder %s30_s16, %s1442_s24  ;;  %p1448_p5 = scmp.lt.s32.totalorder %s1442_s24, %s1442_s24 }
   0xc   :  { %p1449_p6 = por %p1448_p5, %p1447_p4 }
   0xe   :  { %p1450_p7 = pnand %p1449_p6, %p1443_p3 }
  0x10   :  { %1453 = shalt.err (!%p1450_p7)
}
  0x11   :  { %s1527_s25 = smov 64   ;;  %s1528_s26 = smov 4  }
  0x12   :  { %35 = dma.hbm_to_vmem [thread:$0]  %s1638_s1, 2048, %s30_s16, [#allocation6], %s1527_s25, %s1527_s25, %s1528_s26  }
  0x13   :  { %s1529_s29 = smov [#allocation2]   ;;  %s1454_s7 = scalar_lea.hbm %s1637_s0, 1024 }
  0x14   :  { %s17_s30 = sshll.u32 %s1529_s29, 4  ;;  %p1455_p8 = scmp.ne.s32.totalorder %s1637_s0, %s1454_s7  ;;  %s18_s30 = int_to_ptr.vmem [resolvable:$true] %s17_s30 }
  0x15   :  { %p1458_p9 = scmp.lt.u32.totalorder %s1454_s7, %s1637_s0 }
  0x17   :  { %p1460_p10 = pnand %p1458_p9, %p1455_p8 }
  0x19   :  { %1463 = shalt.err (!%p1460_p10)
}
  0x1a   :  { %s1464_s12 = scalar_lea.vmem %s18_s30, 1024  ;;  %p1469_p12 = scmp.lt.s32.totalorder %s18_s30, %s18_s30 }
  0x1b   :  { %p1465_p11 = scmp.ne.s32.totalorder %s18_s30, %s1464_s12  ;;  %p1470_p13 = scmp.lt.s32.totalorder %s1464_s12, %s1464_s12 }
  0x1d   :  { %p1471_p0 = por %p1470_p13, %p1469_p12 }
  0x1f   :  { %p1472_p1 = pnand %p1471_p0, %p1465_p11 }
  0x21   :  { %1475 = shalt.err (!%p1472_p1)
}
  0x22   :  { %s1530_s1 = smov 128   ;;  %s1531_s13 = smov 8  }
  0x23   :  { %23 = dma.hbm_to_vmem [thread:$0]  %s1637_s0, 1024, %s18_s30, [#allocation3], %s1530_s1, %s1530_s1, %s1531_s13  }
  0x24   :  { %s1532_s16 = smov [#allocation7]   ;;  %s1476_s20 = scalar_lea.hbm %s1639_s2, 5120 }
  0x25   :  { %s41_s17 = sshll.u32 %s1532_s16, 4  ;;  %p1477_p2 = scmp.ne.s32.totalorder %s1639_s2, %s1476_s20  ;;  %s42_s17 = int_to_ptr.vmem [resolvable:$true] %s41_s17 }
  0x26   :  { %p1480_p3 = scmp.lt.u32.totalorder %s1476_s20, %s1639_s2 }
  0x28   :  { %p1482_p4 = pnand %p1480_p3, %p1477_p2 }
  0x2a   :  { %1485 = shalt.err (!%p1482_p4)
}
  0x2b   :  { %s1486_s27 = scalar_lea.vmem %s42_s17, 5120  ;;  %p1491_p6 = scmp.lt.s32.totalorder %s42_s17, %s42_s17 }
  0x2c   :  { %p1487_p5 = scmp.ne.s32.totalorder %s42_s17, %s1486_s27  ;;  %p1492_p7 = scmp.lt.s32.totalorder %s1486_s27, %s1486_s27 }
  0x2e   :  { %p1493_p8 = por %p1492_p7, %p1491_p6 }
  0x30   :  { %p1494_p9 = pnand %p1493_p8, %p1487_p5 }
  0x32   :  { %1497 = shalt.err (!%p1494_p9)
}
  0x33   :  { %47 = dma.hbm_to_vmem [thread:$0]  %s1639_s2, 5120, %s42_s17, [#allocation6], %s1527_s25, %s1527_s25, %s1528_s26  }
  0x34   :  { %1520 = dma.done.wait [#allocation3], 1024  }
  0x35   :  { %1521 = vsyncadd [#allocation3], 4294966272 }
  0x36   :  { %1522 = dma.done.wait [#allocation6], 7168  }
  0x37   :  { %1523 = vsyncadd [#allocation6], 4294960128  ;;  %v1364_v0 = vld [vmem:[#allocation5 + $0x40] sm:$0xff]   ;;  %v1366_v2 = vld [vmem:[#allocation5 + $0x48] sm:$0xff]   ;;  %s1533_s12 = smov [#allocation8]  }
  0x38   :  { %v1365_v1 = vld [vmem:[#allocation5] sm:$0xff]   ;;  %1136 = vmatprep.subr.bf16.mxu0 %v1364_v0  ;;  %v1367_v3 = vld [vmem:[#allocation5 + $0x8] sm:$0xff]   ;;  %v1368_v4 = vld [vmem:[#allocation5 + $0x50] sm:$0xff]   ;;  %s1053_s14 = sshll.u32 %s1533_s12, 4  ;;  %s1054_s14 = int_to_ptr.vmem [resolvable:$true] %s1053_s14 }
  0x39   :  { %1137 = vmatpush3.bf16.msra.mxu0 %v1365_v1  ;;  %v1369_v5 = vld [vmem:[#allocation5 + $0x10] sm:$0xff]   ;;  %v1370_v6 = vld [vmem:[#allocation5 + $0x58] sm:$0xff]   ;;  %v1372_v8 = vld [vmem:[#allocation5 + $0x60] sm:$0xff]   ;;  %p1503_p11 = scmp.lt.s32.totalorder %s1054_s14, %s1054_s14 }
  0x3a   :  { %1138 = vmatprep.subr.bf16.mxu0 %v1366_v2  ;;  %v1371_v7 = vld [vmem:[#allocation5 + $0x18] sm:$0xff]   ;;  %v1373_v9 = vld [vmem:[#allocation5 + $0x20] sm:$0xff]   ;;  %v1374_v10 = vld [vmem:[#allocation5 + $0x68] sm:$0xff]  }
  0x3b   :  { %v1382_v11 = vld [vmem:[#allocation2 + $0x4] ss:$8 sps:$4 sm:$0xff]   ;;  %v1376_v13 = vld [vmem:[#allocation5 + $0x70] sm:$0xff]   ;;  %v1378_v15 = vld [vmem:[#allocation5 + $0x78] sm:$0xff]  }
  0x3c   :  { %v1375_v12 = vld [vmem:[#allocation5 + $0x28] sm:$0xff]   ;;  %273 = vmatprep.mubr.bf16.mxu0 %v1382_v11  ;;  %v1377_v14 = vld [vmem:[#allocation5 + $0x30] sm:$0xff]   ;;  %v1392_v16 = vld [vmem:[#allocation7] sm:$0xff]  }
  0x3d   :  { %1139 = vmatpush3.bf16.msra.mxu0 %v1367_v3  ;;  %v1393_v17 = vld [vmem:[#allocation7 + $0x8] sm:$0xff]   ;;  %1236 = vmatprep.subr.bf16.mxu1 %v1392_v16  ;;  %v1394_v18 = vld [vmem:[#allocation7 + $0x10] sm:$0xff]   ;;  %v1379_v19 = vld [vmem:[#allocation5 + $0x38] sm:$0xff]  }
  0x3e   :  { %1140 = vmatprep.subr.bf16.mxu0 %v1368_v4  ;;  %1237 = vmatpush3.bf16.msra.mxu1 %v1392_v16  ;;  %v1380_v20 = vld [vmem:[#allocation2] ss:$8 sps:$4 sm:$0xff]   ;;  %v1383_v21 = vld [vmem:[#allocation2 + $0x14] ss:$8 sps:$4 sm:$0xff]   ;;  %v1385_v22 = vld [vmem:[#allocation2 + $0x10] ss:$8 sps:$4 sm:$0xff]  }
  0x3f   :  { %1238 = vmatprep.subr.bf16.mxu1 %v1393_v17  ;;  %v1386_v23 = vld [vmem:[#allocation2 + $0x24] ss:$8 sps:$4 sm:$0xff]   ;;  %v1388_v24 = vld [vmem:[#allocation2 + $0x20] ss:$8 sps:$4 sm:$0xff]   ;;  %v1389_v25 = vld [vmem:[#allocation2 + $0x34] ss:$8 sps:$4 sm:$0xff]  }
  0x40   :  { %v1391_v26 = vld [vmem:[#allocation2 + $0x30] ss:$8 sps:$4 sm:$0xff]   ;;  %v1396_v28 = vld [vmem:[#allocation7 + $0x20] sm:$0xff]   ;;  %v1397_v29 = vld [vmem:[#allocation7 + $0x28] sm:$0xff]  }
  0x41   :  { %1141 = vmatpush3.bf16.msra.mxu0 %v1369_v5  ;;  %v1395_v27 = vld [vmem:[#allocation7 + $0x18] sm:$0xff]   ;;  %v1398_v30 = vld [vmem:[#allocation7 + $0x30] sm:$0xff]   ;;  %v1400_v32 = vld [vmem:[#allocation7 + $0x40] sm:$0xff]  }
  0x42   :  { %1142 = vmatprep.subr.bf16.mxu0 %v1370_v6  ;;  %1239 = vmatpush3.bf16.msra.mxu1 %v1393_v17  ;;  %v1399_v31 = vld [vmem:[#allocation7 + $0x38] sm:$0xff]   ;;  %v1401_v33 = vld [vmem:[#allocation7 + $0x48] sm:$0xff]   ;;  %v1402_v34 = vld [vmem:[#allocation7 + $0x50] sm:$0xff]  }
  0x43   :  { %1240 = vmatprep.subr.bf16.mxu1 %v1394_v18  ;;  %v1403_v35 = vld [vmem:[#allocation7 + $0x58] sm:$0xff]   ;;  %v1404_v36 = vld [vmem:[#allocation7 + $0x60] sm:$0xff]   ;;  %v1405_v37 = vld [vmem:[#allocation7 + $0x68] sm:$0xff]  }
  0x44   :  { %v1066_v40 = vld [vmem:[%s1640_s3] ss:$0 sm:$0xff] }
  0x45   :  { %1143 = vmatpush3.bf16.msra.mxu0 %v1371_v7 }
  0x46   :  { %1144 = vmatprep.subr.bf16.mxu0 %v1372_v8  ;;  %1241 = vmatpush3.bf16.msra.mxu1 %v1394_v18 }
  0x47   :  { %1242 = vmatprep.subr.bf16.mxu1 %v1395_v27 }
  0x49   :  { %1145 = vmatpush3.bf16.msra.mxu0 %v1373_v9 }
  0x4a   :  { %1146 = vmatprep.subr.bf16.mxu0 %v1374_v10  ;;  %1243 = vmatpush3.bf16.msra.mxu1 %v1395_v27  ;;  %v1091_v27 = vld [vmem:[%s1640_s3 + $0x1] ss:$0 sm:$0xff] }
  0x4b   :  { %1244 = vmatprep.subr.bf16.mxu1 %v1396_v28 }
  0x4d   :  { %1147 = vmatpush3.bf16.msra.mxu0 %v1375_v12 }
  0x4e   :  { %1148 = vmatprep.subr.bf16.mxu0 %v1376_v13  ;;  %1245 = vmatpush3.bf16.msra.mxu1 %v1396_v28 }
  0x4f   :  { %1246 = vmatprep.subr.bf16.mxu1 %v1397_v29 }
  0x51   :  { %1149 = vmatpush3.bf16.msra.mxu0 %v1377_v14 }
  0x52   :  { %1150 = vmatprep.subr.bf16.mxu0 %v1378_v15  ;;  %1247 = vmatpush3.bf16.msra.mxu1 %v1397_v29 }
  0x53   :  { %1248 = vmatprep.subr.bf16.mxu1 %v1398_v30 }
  0x55   :  { %1151 = vmatpush3.bf16.msra.mxu0 %v1379_v19  ;;  %v1406_v19 = vld [vmem:[#allocation7 + $0x70] sm:$0xff]  }
  0x56   :  { %1249 = vmatpush3.bf16.msra.mxu1 %v1398_v30  ;;  %1260 = vmatprep.subr.bf16.mxu0 %v1400_v32 }
  0x57   :  { %1250 = vmatprep.subr.bf16.mxu1 %v1399_v31 }
  0x58   :  { %274 = vmatmul.mubr.bf16.vlgmr.msra.gmra.mrb[0].mxu0 %v1380_v20  ;;  %v1407_v20 = vld [vmem:[#allocation7 + $0x78] sm:$0xff]  }
  0x59   :  { %281 = vmatprep.mubr.bf16.mxu0 %v1383_v21  ;;  %1261 = vmatpush3.bf16.msra.mxu0 %v1400_v32  ;;  %v1408_v21 = vld [vmem:[#allocation7 + $0x80] sm:$0xff]  }
  0x5a   :  { %1251 = vmatpush3.bf16.msra.mxu1 %v1399_v31  ;;  %1262 = vmatprep.subr.bf16.mxu0 %v1401_v33 }
  0x5b   :  { %1284 = vmatprep.subr.bf16.mxu1 %v1408_v21 }
  0x5d   :  { %1263 = vmatpush3.bf16.msra.mxu0 %v1401_v33 }
  0x5e   :  { %1264 = vmatprep.subr.bf16.mxu0 %v1402_v34 }
  0x60   :  { %282 = vmatmul.mubr.bf16.gmra.mrb[4].mxu0 %v1385_v22  ;;  %v1409_v22 = vld [vmem:[#allocation7 + $0x88] sm:$0xff]  }
  0x61   :  { %289 = vmatprep.mubr.bf16.mxu0 %v1386_v23  ;;  %1265 = vmatpush3.bf16.msra.mxu0 %v1402_v34  ;;  %v1410_v23 = vld [vmem:[#allocation7 + $0x90] sm:$0xff]  }
  0x62   :  { %1266 = vmatprep.subr.bf16.mxu0 %v1403_v35 }
  0x65   :  { %1267 = vmatpush3.bf16.msra.mxu0 %v1403_v35 }
  0x66   :  { %1268 = vmatprep.subr.bf16.mxu0 %v1404_v36 }
  0x68   :  { %290 = vmatmul.mubr.bf16.gmra.mrb[8].mxu0 %v1388_v24  ;;  %v1411_v24 = vld [vmem:[#allocation7 + $0x98] sm:$0xff]  }
  0x69   :  { %297 = vmatprep.mubr.bf16.mxu0 %v1389_v25  ;;  %1269 = vmatpush3.bf16.msra.mxu0 %v1404_v36  ;;  %v1412_v25 = vld [vmem:[#allocation7 + $0xa0] sm:$0xff]  }
  0x6a   :  { %1270 = vmatprep.subr.bf16.mxu0 %v1405_v37 }
  0x6d   :  { %1271 = vmatpush3.bf16.msra.mxu0 %v1405_v37 }
  0x6e   :  { %1272 = vmatprep.subr.bf16.mxu0 %v1406_v19 }
  0x70   :  { %298 = vmatmul.mubr.bf16.gmra.mrb[12].mxu0 %v1391_v26  ;;  %v1413_v26 = vld [vmem:[#allocation7 + $0xa8] sm:$0xff]  }
  0x71   :  { %1273 = vmatpush3.bf16.msra.mxu0 %v1406_v19 }
  0x72   :  { %1274 = vmatprep.subr.bf16.mxu0 %v1407_v20 }
  0x75   :  { %1275 = vmatpush3.bf16.msra.mxu0 %v1407_v20 }
 0x12b   :  { %v1152_v38 = vpop.f32.mrb[0].mxu0 }
 0x12c   :  { %v1153_v39 = vpop.f32.mrb[1].mxu0 }
 0x12d   :  { %v1154_v41 = vadd.f32 %v1153_v39, %v1152_v38  ;;  %v1155_v42 = vpop.f32.mrb[2].mxu0 }
 0x12e   :  { %v1156_v43 = vpop.f32.mrb[3].mxu0 }
 0x12f   :  { %v1157_v44 = vadd.f32 %v1156_v43, %v1155_v42  ;;  %v276_v45 = vadd.f32 %v1154_v41, %v1066_v40 }
 0x131   :  { %v279_v46 = vadd.f32 %v1157_v44, %v1066_v40  ;;  %v306_v48 = vmax.f32 %v276_v45, 0.0 }
 0x133   :  { %v1158_v47 = vpop.f32.mrb[4].mxu0  ;;  %v307_v49 = vmax.f32 %v279_v46, 0.0 }
 0x134   :  { %v1159_v50 = vpop.f32.mrb[5].mxu0 }
 0x135   :  { %v1160_v51 = vadd.f32 %v1159_v50, %v1158_v47  ;;  %v1161_v52 = vpop.f32.mrb[6].mxu0  ;;  %v314_v53 = vpack.c.bf16 %v307_v49, %v306_v48 }
 0x136   :  { %v1162_v54 = vpop.f32.mrb[7].mxu0 }
 0x137   :  { %v284_v55 = vadd.f32 %v1160_v51, %v1066_v40  ;;  %v1163_v56 = vadd.f32 %v1162_v54, %v1161_v52  ;;  %1252 = vmatprep.mubr.bf16.mxu1 %v314_v53 }
 0x139   :  { %v287_v57 = vadd.f32 %v1163_v56, %v1066_v40  ;;  %v308_v58 = vmax.f32 %v284_v55, 0.0  ;;  %v1414_v56 = vld [vmem:[#allocation7 + $0xb0] sm:$0xff]  }
 0x13b   :  { %v309_v59 = vmax.f32 %v287_v57, 0.0  ;;  %v1164_v60 = vpop.f32.mrb[8].mxu0  ;;  %v1415_v57 = vld [vmem:[#allocation7 + $0xb8] sm:$0xff]  }
 0x13c   :  { %v1165_v61 = vpop.f32.mrb[9].mxu0 }
 0x13d   :  { %v1166_v62 = vadd.f32 %v1165_v61, %v1164_v60  ;;  %v1167_v63 = vpop.f32.mrb[10].mxu0  ;;  %v315_v0 = vpack.c.bf16 %v309_v59, %v308_v58  ;;  %v1416_v58 = vld [vmem:[#allocation7 + $0xc0] sm:$0xff]   ;;  %v1417_v59 = vld [vmem:[#allocation7 + $0xc8] sm:$0xff]   ;;  %v1418_v60 = vld [vmem:[#allocation7 + $0xd0] sm:$0xff]  }
 0x13e   :  { %v1168_v1 = vpop.f32.mrb[11].mxu0  ;;  %1308 = vmatprep.subr.bf16.mxu0 %v1416_v58  ;;  %v1419_v61 = vld [vmem:[#allocation7 + $0xd8] sm:$0xff]  }
 0x13f   :  { %v292_v2 = vadd.f32 %v1166_v62, %v1066_v40  ;;  %v1169_v3 = vadd.f32 %v1168_v1, %v1167_v63  ;;  %1253 = vmatmul.mubr.bf16.vlgmr.msra.gmra.mrb[0].mxu1 %v315_v0  ;;  %v1420_v62 = vld [vmem:[#allocation7 + $0xe0] sm:$0xff]   ;;  %v1421_v63 = vld [vmem:[#allocation7 + $0xe8] sm:$0xff]  }
 0x140   :  { %1285 = vmatpush3.bf16.msra.mxu1 %v1408_v21  ;;  %v1100_v0 = vld [vmem:[%s1640_s3 + $0x2] ss:$0 sm:$0xff] }
 0x141   :  { %v295_v4 = vadd.f32 %v1169_v3, %v1066_v40  ;;  %v310_v5 = vmax.f32 %v292_v2, 0.0  ;;  %1286 = vmatprep.subr.bf16.mxu1 %v1409_v22 }
 0x143   :  { %v311_v6 = vmax.f32 %v295_v4, 0.0  ;;  %v1170_v7 = vpop.f32.mrb[12].mxu0 }
 0x144   :  { %v1171_v8 = vpop.f32.mrb[13].mxu0  ;;  %1287 = vmatpush3.bf16.msra.mxu1 %v1409_v22 }
 0x145   :  { %v1172_v9 = vadd.f32 %v1171_v8, %v1170_v7  ;;  %v1173_v10 = vpop.f32.mrb[14].mxu0  ;;  %v316_v11 = vpack.c.bf16 %v311_v6, %v310_v5  ;;  %1288 = vmatprep.subr.bf16.mxu1 %v1410_v23 }
 0x146   :  { %v1174_v12 = vpop.f32.mrb[15].mxu0 }
 0x147   :  { %v300_v13 = vadd.f32 %v1172_v9, %v1066_v40  ;;  %v1175_v14 = vadd.f32 %v1174_v12, %v1173_v10  ;;  %1256 = vmatprep.mubr.bf16.mxu1 %v316_v11 }
 0x148   :  { %1289 = vmatpush3.bf16.msra.mxu1 %v1410_v23 }
 0x149   :  { %v303_v15 = vadd.f32 %v1175_v14, %v1066_v40  ;;  %v312_v16 = vmax.f32 %v300_v13, 0.0  ;;  %1290 = vmatprep.subr.bf16.mxu1 %v1411_v24 }
 0x14b   :  { %v313_v17 = vmax.f32 %v303_v15, 0.0 }
 0x14c   :  { %1291 = vmatpush3.bf16.msra.mxu1 %v1411_v24 }
 0x14d   :  { %v317_v18 = vpack.c.bf16 %v313_v17, %v312_v16  ;;  %1292 = vmatprep.subr.bf16.mxu1 %v1412_v25 }
 0x14f   :  { %1257 = vmatmul.mubr.bf16.gmra.mrb[4].mxu1 %v317_v18 }
 0x150   :  { %1293 = vmatpush3.bf16.msra.mxu1 %v1412_v25 }
 0x151   :  { %1294 = vmatprep.subr.bf16.mxu1 %v1413_v26 }
 0x154   :  { %1295 = vmatpush3.bf16.msra.mxu1 %v1413_v26 }
 0x155   :  { %1296 = vmatprep.subr.bf16.mxu1 %v1414_v56 }
 0x158   :  { %1297 = vmatpush3.bf16.msra.mxu1 %v1414_v56 }
 0x159   :  { %1298 = vmatprep.subr.bf16.mxu1 %v1415_v57 }
 0x15c   :  { %1299 = vmatpush3.bf16.msra.mxu1 %v1415_v57 }
 0x212   :  { %v1254_v28 = vpop.f32.mrb[0].mxu1 }
 0x213   :  { %v430_v29 = vadd.f32 %v1254_v28, %v1091_v27  ;;  %v421_v30 = vpop.f32.mrb[1].mxu1 }
 0x214   :  { %v422_v31 = vadd.f32 %v1091_v27, %v421_v30  ;;  %v1255_v32 = vpop.f32.mrb[2].mxu1  ;;  %v1423_v30 = vld [vmem:[#allocation7 + $0xf8] sm:$0xff]  }
 0x215   :  { %v433_v33 = vadd.f32 %v1255_v32, %v1091_v27  ;;  %v424_v34 = vpop.f32.mrb[3].mxu1  ;;  %v454_v36 = vmax.f32 %v430_v29, 0.0  ;;  %v1422_v29 = vld [vmem:[#allocation7 + $0xf0] sm:$0xff]   ;;  %v1425_v32 = vld [vmem:[#allocation7 + $0x108] sm:$0xff]  }
 0x216   :  { %v425_v35 = vadd.f32 %v1091_v27, %v424_v34  ;;  %v452_v38 = vmax.f32 %v422_v31, 0.0  ;;  %v1424_v31 = vld [vmem:[#allocation7 + $0x100] sm:$0xff]   ;;  %v1427_v34 = vld [vmem:[#allocation7 + $0x118] sm:$0xff]  }
 0x217   :  { %v455_v37 = vmax.f32 %v433_v33, 0.0  ;;  %1332 = vmatprep.subr.bf16.mxu1 %v1424_v31  ;;  %v1426_v33 = vld [vmem:[#allocation7 + $0x110] sm:$0xff]  }
 0x218   :  { %v453_v39 = vmax.f32 %v425_v35, 0.0  ;;  %v1428_v35 = vld [vmem:[#allocation7 + $0x120] sm:$0xff]  }
 0x219   :  { %v461_v40 = vpack.c.bf16 %v455_v37, %v454_v36  ;;  %v1429_v36 = vld [vmem:[#allocation7 + $0x128] sm:$0xff]   ;;  %v1109_v37 = vld [vmem:[%s1640_s3 + $0x3] ss:$0 sm:$0xff] }
 0x21a   :  { %v460_v41 = vpack.c.bf16 %v453_v39, %v452_v38 }
 0x21c   :  { %1276 = vmatprep.mubr.bf16.mxu0 %v460_v41 }
 0x21d   :  { %1277 = vmatmul.mubr.bf16.vlgmr.msra.gmra.mrb[16].mxu0 %v461_v40 }
 0x21e   :  { %1309 = vmatpush3.bf16.msra.mxu0 %v1416_v58 }
 0x21f   :  { %1310 = vmatprep.subr.bf16.mxu0 %v1417_v59 }
 0x222   :  { %v1258_v42 = vpop.f32.mrb[4].mxu1  ;;  %1311 = vmatpush3.bf16.msra.mxu0 %v1417_v59 }
 0x223   :  { %v446_v43 = vadd.f32 %v1258_v42, %v1091_v27  ;;  %v437_v44 = vpop.f32.mrb[5].mxu1  ;;  %1312 = vmatprep.subr.bf16.mxu0 %v1418_v60 }
 0x224   :  { %v438_v45 = vadd.f32 %v1091_v27, %v437_v44  ;;  %v1259_v46 = vpop.f32.mrb[6].mxu1 }
 0x225   :  { %v449_v47 = vadd.f32 %v1259_v46, %v1091_v27  ;;  %v440_v48 = vpop.f32.mrb[7].mxu1  ;;  %v458_v50 = vmax.f32 %v446_v43, 0.0 }
 0x226   :  { %v441_v49 = vadd.f32 %v1091_v27, %v440_v48  ;;  %v456_v52 = vmax.f32 %v438_v45, 0.0  ;;  %1313 = vmatpush3.bf16.msra.mxu0 %v1418_v60 }
 0x227   :  { %v459_v51 = vmax.f32 %v449_v47, 0.0  ;;  %1314 = vmatprep.subr.bf16.mxu0 %v1419_v61 }
 0x228   :  { %v457_v53 = vmax.f32 %v441_v49, 0.0 }
 0x229   :  { %v463_v54 = vpack.c.bf16 %v459_v51, %v458_v50 }
 0x22a   :  { %v462_v55 = vpack.c.bf16 %v457_v53, %v456_v52  ;;  %1315 = vmatpush3.bf16.msra.mxu0 %v1419_v61 }
 0x22b   :  { %1316 = vmatprep.subr.bf16.mxu0 %v1420_v62 }
 0x22c   :  { %1280 = vmatprep.mubr.bf16.mxu0 %v462_v55 }
 0x22d   :  { %1281 = vmatmul.mubr.bf16.gmra.mrb[20].mxu0 %v463_v54 }
 0x22e   :  { %1317 = vmatpush3.bf16.msra.mxu0 %v1420_v62 }
 0x22f   :  { %1318 = vmatprep.subr.bf16.mxu0 %v1421_v63 }
 0x232   :  { %1319 = vmatpush3.bf16.msra.mxu0 %v1421_v63 }
 0x233   :  { %1320 = vmatprep.subr.bf16.mxu0 %v1422_v29 }
 0x236   :  { %1321 = vmatpush3.bf16.msra.mxu0 %v1422_v29 }
 0x237   :  { %1322 = vmatprep.subr.bf16.mxu0 %v1423_v30 }
 0x23a   :  { %1323 = vmatpush3.bf16.msra.mxu0 %v1423_v30 }
 0x2f0   :  { %v1278_v1 = vpop.f32.mrb[16].mxu0 }
 0x2f1   :  { %v577_v2 = vadd.f32 %v1278_v1, %v1100_v0  ;;  %v568_v3 = vpop.f32.mrb[17].mxu0 }
 0x2f2   :  { %v569_v4 = vadd.f32 %v1100_v0, %v568_v3  ;;  %v1279_v5 = vpop.f32.mrb[18].mxu0  ;;  %v1431_v3 = vld [vmem:[#allocation7 + $0x138] sm:$0xff]  }
 0x2f3   :  { %v580_v6 = vadd.f32 %v1279_v5, %v1100_v0  ;;  %v571_v7 = vpop.f32.mrb[19].mxu0  ;;  %v601_v9 = vmax.f32 %v577_v2, 0.0  ;;  %v1430_v2 = vld [vmem:[#allocation7 + $0x130] sm:$0xff]  }
 0x2f4   :  { %v572_v8 = vadd.f32 %v1100_v0, %v571_v7  ;;  %v599_v11 = vmax.f32 %v569_v4, 0.0  ;;  %v1118_v4 = vld [vmem:[%s1640_s3 + $0x4] ss:$0 sm:$0xff] }
 0x2f5   :  { %v602_v10 = vmax.f32 %v580_v6, 0.0 }
 0x2f6   :  { %v600_v12 = vmax.f32 %v572_v8, 0.0 }
 0x2f7   :  { %v608_v13 = vpack.c.bf16 %v602_v10, %v601_v9 }
 0x2f8   :  { %v607_v14 = vpack.c.bf16 %v600_v12, %v599_v11 }
 0x2fa   :  { %1300 = vmatprep.mubr.bf16.mxu1 %v607_v14 }
 0x2fb   :  { %1301 = vmatmul.mubr.bf16.vlgmr.msra.gmra.mrb[8].mxu1 %v608_v13 }
 0x2fc   :  { %1333 = vmatpush3.bf16.msra.mxu1 %v1424_v31 }
 0x2fd   :  { %1334 = vmatprep.subr.bf16.mxu1 %v1425_v32 }
 0x300   :  { %v1282_v15 = vpop.f32.mrb[20].mxu0  ;;  %1335 = vmatpush3.bf16.msra.mxu1 %v1425_v32 }
 0x301   :  { %v593_v16 = vadd.f32 %v1282_v15, %v1100_v0  ;;  %v584_v17 = vpop.f32.mrb[21].mxu0  ;;  %1336 = vmatprep.subr.bf16.mxu1 %v1426_v33 }
 0x302   :  { %v585_v18 = vadd.f32 %v1100_v0, %v584_v17  ;;  %v1283_v19 = vpop.f32.mrb[22].mxu0 }
 0x303   :  { %v596_v20 = vadd.f32 %v1283_v19, %v1100_v0  ;;  %v587_v21 = vpop.f32.mrb[23].mxu0  ;;  %v605_v23 = vmax.f32 %v593_v16, 0.0 }
 0x304   :  { %v588_v22 = vadd.f32 %v1100_v0, %v587_v21  ;;  %v603_v25 = vmax.f32 %v585_v18, 0.0  ;;  %1337 = vmatpush3.bf16.msra.mxu1 %v1426_v33  ;;  %v1127_v33 = vld [vmem:[%s1640_s3 + $0x5] ss:$0 sm:$0xff]  ;;  %s1498_s3 = scalar_lea.vmem %s1054_s14, 1024 }
 0x305   :  { %v606_v24 = vmax.f32 %v596_v20, 0.0  ;;  %1338 = vmatprep.subr.bf16.mxu1 %v1427_v34  ;;  %p1499_p10 = scmp.ne.s32.totalorder %s1054_s14, %s1498_s3  ;;  %p1504_p12 = scmp.lt.s32.totalorder %s1498_s3, %s1498_s3 }
 0x306   :  { %v604_v26 = vmax.f32 %v588_v22, 0.0 }
 0x307   :  { %v610_v27 = vpack.c.bf16 %v606_v24, %v605_v23  ;;  %p1505_p13 = por %p1504_p12, %p1503_p11 }
 0x308   :  { %v609_v28 = vpack.c.bf16 %v604_v26, %v603_v25  ;;  %1339 = vmatpush3.bf16.msra.mxu1 %v1427_v34 }
 0x309   :  { %1340 = vmatprep.subr.bf16.mxu1 %v1428_v35  ;;  %p1506_p0 = pnand %p1505_p13, %p1499_p10 }
 0x30a   :  { %1304 = vmatprep.mubr.bf16.mxu1 %v609_v28 }
 0x30b   :  { %1305 = vmatmul.mubr.bf16.gmra.mrb[12].mxu1 %v610_v27 }
 0x30c   :  { %1341 = vmatpush3.bf16.msra.mxu1 %v1428_v35 }
 0x30d   :  { %1342 = vmatprep.subr.bf16.mxu1 %v1429_v36 }
 0x310   :  { %1343 = vmatpush3.bf16.msra.mxu1 %v1429_v36 }
 0x311   :  { %1344 = vmatprep.subr.bf16.mxu1 %v1430_v2 }
 0x314   :  { %1345 = vmatpush3.bf16.msra.mxu1 %v1430_v2 }
 0x315   :  { %1346 = vmatprep.subr.bf16.mxu1 %v1431_v3 }
 0x318   :  { %1347 = vmatpush3.bf16.msra.mxu1 %v1431_v3 }
 0x3ce   :  { %v1302_v38 = vpop.f32.mrb[8].mxu1 }
 0x3cf   :  { %v724_v39 = vadd.f32 %v1302_v38, %v1109_v37  ;;  %v715_v40 = vpop.f32.mrb[9].mxu1 }
 0x3d0   :  { %v716_v41 = vadd.f32 %v1109_v37, %v715_v40  ;;  %v1303_v42 = vpop.f32.mrb[10].mxu1 }
 0x3d1   :  { %v727_v43 = vadd.f32 %v1303_v42, %v1109_v37  ;;  %v718_v44 = vpop.f32.mrb[11].mxu1  ;;  %v748_v46 = vmax.f32 %v724_v39, 0.0 }
 0x3d2   :  { %v719_v45 = vadd.f32 %v1109_v37, %v718_v44  ;;  %v746_v48 = vmax.f32 %v716_v41, 0.0 }
 0x3d3   :  { %v749_v47 = vmax.f32 %v727_v43, 0.0 }
 0x3d4   :  { %v747_v49 = vmax.f32 %v719_v45, 0.0 }
 0x3d5   :  { %v755_v50 = vpack.c.bf16 %v749_v47, %v748_v46 }
 0x3d6   :  { %v754_v51 = vpack.c.bf16 %v747_v49, %v746_v48 }
 0x3d8   :  { %1324 = vmatprep.mubr.bf16.mxu0 %v754_v51 }
 0x3d9   :  { %1325 = vmatmul.mubr.bf16.vlgmr.msra.gmra.mrb[24].mxu0 %v755_v50 }
 0x3de   :  { %v1306_v52 = vpop.f32.mrb[12].mxu1 }
 0x3df   :  { %v740_v53 = vadd.f32 %v1306_v52, %v1109_v37  ;;  %v731_v54 = vpop.f32.mrb[13].mxu1 }
 0x3e0   :  { %v732_v55 = vadd.f32 %v1109_v37, %v731_v54  ;;  %v1307_v56 = vpop.f32.mrb[14].mxu1 }
 0x3e1   :  { %v743_v57 = vadd.f32 %v1307_v56, %v1109_v37  ;;  %v734_v58 = vpop.f32.mrb[15].mxu1  ;;  %v752_v60 = vmax.f32 %v740_v53, 0.0 }
 0x3e2   :  { %v735_v59 = vadd.f32 %v1109_v37, %v734_v58  ;;  %v750_v62 = vmax.f32 %v732_v55, 0.0 }
 0x3e3   :  { %v753_v61 = vmax.f32 %v743_v57, 0.0 }
 0x3e4   :  { %v751_v63 = vmax.f32 %v735_v59, 0.0 }
 0x3e5   :  { %v757_v0 = vpack.c.bf16 %v753_v61, %v752_v60 }
 0x3e6   :  { %v756_v1 = vpack.c.bf16 %v751_v63, %v750_v62 }
 0x3e8   :  { %1328 = vmatprep.mubr.bf16.mxu0 %v756_v1 }
 0x3e9   :  { %1329 = vmatmul.mubr.bf16.gmra.mrb[28].mxu0 %v757_v0 }
 0x4ac   :  { %v1326_v5 = vpop.f32.mrb[24].mxu0 }
 0x4ad   :  { %v871_v6 = vadd.f32 %v1326_v5, %v1118_v4  ;;  %v862_v7 = vpop.f32.mrb[25].mxu0 }
 0x4ae   :  { %v863_v8 = vadd.f32 %v1118_v4, %v862_v7  ;;  %v1327_v9 = vpop.f32.mrb[26].mxu0 }
 0x4af   :  { %v874_v10 = vadd.f32 %v1327_v9, %v1118_v4  ;;  %v865_v11 = vpop.f32.mrb[27].mxu0  ;;  %v895_v13 = vmax.f32 %v871_v6, 0.0 }
 0x4b0   :  { %v866_v12 = vadd.f32 %v1118_v4, %v865_v11  ;;  %v893_v15 = vmax.f32 %v863_v8, 0.0 }
 0x4b1   :  { %v896_v14 = vmax.f32 %v874_v10, 0.0 }
 0x4b2   :  { %v894_v16 = vmax.f32 %v866_v12, 0.0 }
 0x4b3   :  { %v902_v17 = vpack.c.bf16 %v896_v14, %v895_v13 }
 0x4b4   :  { %v901_v18 = vpack.c.bf16 %v894_v16, %v893_v15 }
 0x4b6   :  { %1348 = vmatprep.mubr.bf16.mxu1 %v901_v18 }
 0x4b7   :  { %1349 = vmatmul.mubr.bf16.vlgmr.msra.gmra.mrb[16].mxu1 %v902_v17 }
 0x4bc   :  { %v1330_v19 = vpop.f32.mrb[28].mxu0 }
 0x4bd   :  { %v887_v20 = vadd.f32 %v1330_v19, %v1118_v4  ;;  %v878_v21 = vpop.f32.mrb[29].mxu0 }
 0x4be   :  { %v879_v22 = vadd.f32 %v1118_v4, %v878_v21  ;;  %v1331_v23 = vpop.f32.mrb[30].mxu0 }
 0x4bf   :  { %v890_v24 = vadd.f32 %v1331_v23, %v1118_v4  ;;  %v881_v25 = vpop.f32.mrb[31].mxu0  ;;  %v899_v27 = vmax.f32 %v887_v20, 0.0 }
 0x4c0   :  { %v882_v26 = vadd.f32 %v1118_v4, %v881_v25  ;;  %v897_v29 = vmax.f32 %v879_v22, 0.0 }
 0x4c1   :  { %v900_v28 = vmax.f32 %v890_v24, 0.0 }
 0x4c2   :  { %v898_v30 = vmax.f32 %v882_v26, 0.0 }
 0x4c3   :  { %v904_v31 = vpack.c.bf16 %v900_v28, %v899_v27 }
 0x4c4   :  { %v903_v32 = vpack.c.bf16 %v898_v30, %v897_v29 }
 0x4c6   :  { %1352 = vmatprep.mubr.bf16.mxu1 %v903_v32 }
 0x4c7   :  { %1353 = vmatmul.mubr.bf16.gmra.mrb[20].mxu1 %v904_v31 }
 0x58a   :  { %v1350_v34 = vpop.f32.mrb[16].mxu1 }
 0x58b   :  { %v1018_v35 = vadd.f32 %v1350_v34, %v1127_v33  ;;  %v1009_v36 = vpop.f32.mrb[17].mxu1 }
 0x58c   :  { %v1010_v37 = vadd.f32 %v1127_v33, %v1009_v36  ;;  %v1351_v38 = vpop.f32.mrb[18].mxu1 }
 0x58d   :  { %1042 = vst [vmem:[#allocation8 + $0x10] sm:$0xff] %v1018_v35  ;;  %v1021_v39 = vadd.f32 %v1351_v38, %v1127_v33  ;;  %v1012_v40 = vpop.f32.mrb[19].mxu1 }
 0x58e   :  { %1040 = vst [vmem:[#allocation8] sm:$0xff] %v1010_v37  ;;  %v1013_v41 = vadd.f32 %v1127_v33, %v1012_v40 }
 0x58f   :  { %1043 = vst [vmem:[#allocation8 + $0x18] sm:$0xff] %v1021_v39 }
 0x590   :  { %1041 = vst [vmem:[#allocation8 + $0x8] sm:$0xff] %v1013_v41 }
 0x59a   :  { %v1354_v42 = vpop.f32.mrb[20].mxu1 }
 0x59b   :  { %v1034_v43 = vadd.f32 %v1354_v42, %v1127_v33  ;;  %v1025_v44 = vpop.f32.mrb[21].mxu1 }
 0x59c   :  { %v1026_v45 = vadd.f32 %v1127_v33, %v1025_v44  ;;  %v1355_v46 = vpop.f32.mrb[22].mxu1 }
 0x59d   :  { %1046 = vst [vmem:[#allocation8 + $0x30] sm:$0xff] %v1034_v43  ;;  %v1037_v47 = vadd.f32 %v1355_v46, %v1127_v33  ;;  %v1028_v48 = vpop.f32.mrb[23].mxu1 }
 0x59e   :  { %1044 = vst [vmem:[#allocation8 + $0x20] sm:$0xff] %v1026_v45  ;;  %v1029_v49 = vadd.f32 %v1127_v33, %v1028_v48 }
 0x59f   :  { %1047 = vst [vmem:[#allocation8 + $0x38] sm:$0xff] %v1037_v47 }
 0x5a0   :  { %1045 = vst [vmem:[#allocation8 + $0x28] sm:$0xff] %v1029_v49 }
 0x5a1   :  { %1509 = shalt.err (!%p1506_p0)
}
 0x5a2   :  { %s1510_s17 = scalar_lea.hbm %s1641_s4, 1024 }
 0x5a3   :  { %p1511_p1 = scmp.ne.s32.totalorder %s1641_s4, %s1510_s17  ;;  %p1514_p2 = scmp.lt.u32.totalorder %s1510_s17, %s1641_s4 }
 0x5a5   :  { %p1516_p3 = pnand %p1514_p2, %p1511_p1 }
 0x5a7   :  { %1519 = shalt.err (!%p1516_p3)
}
 0x5a8   :  { %1059 = dma.vmem_to_hbm [thread:$0]  %s1054_s14, 1024, %s1641_s4, [#allocation4], %s1530_s1, %s1530_s1, %s1531_s13  }
 0x5a9   :  { %1524 = dma.done.wait [#allocation4], 1024  }
 0x5aa   :  { %1525 = vsyncadd [#allocation4], 4294966272 }
 0x5ab   :  { %1063 = vsyncpa [#allocation3], 1 }
 0x5ac   :  { %1064 = vsyncpa [#allocation6], 1 }
 0x5ad   :  { %1065 = vsyncpa [#allocation4], 1 }

</bundles_post_ra>
